<compile_context>
chip_gen: v7x
topology: tpu7x:2x2x1
jax: 0.10.0
libtpu: 0.0.40
codegen_flags: <defaults>
</compile_context>

<pallas_src>
import functools

import jax
import jax.numpy as jnp
from jax.experimental import pallas as pl
from jax.experimental.pallas import tpu as pltpu

LANES = 128
# Per-grid-step input budget (both operands, one buffer). Double-buffered this
# is ~16 MiB, which fits under the 32 MiB scoped-VMEM limit requested below
# (v5e default scoped is 16 MiB -> raised; v7x physical is 64 MiB -> safe).
_STEP_INPUT_BYTES = 8 << 20
_VMEM_LIMIT_BYTES = 32 << 20


@functools.lru_cache(maxsize=None)
def _tc_split_config():
    """(num_splits, use_core_parallel): split across TensorCores on v7x only."""
    try:
        kind = jax.devices()[0].device_kind.lower()
    except Exception:  # pragma: no cover
        return 1, False
    if "v7" in kind:              # 2 TensorCores per chip
        return 2, True
    return 1, False               # v5e / v6e: single TensorCore


def _round_up(a, b):
    return ((a + b - 1) // b) * b


def _bce_sum_kernel(pw_ref, x_ref, y_ref, out_ref, acc_ref, *,
                    block_rows, tiles_per_split, valid_rows):
    c = pl.program_id(0)          # TensorCore split (CORE_PARALLEL on v7x)
    i = pl.program_id(1)          # reduction step within split ("arbitrary")

    @pl.when(i == 0)
    def _():
        acc_ref[...] = jnp.zeros_like(acc_ref)

    x = x_ref[...].astype(jnp.float32)
    y = y_ref[...].astype(jnp.float32)
    pw = pw_ref[0]
    w1 = pw - 1.0                 # scalar, hoisted out of the vector math

    # Numerically stable softplus(-x) = log(1 + exp(-x)).
    sp_neg = jnp.maximum(-x, 0.0) + jnp.log1p(jnp.exp(-jnp.abs(x)))
    # loss = -[pw*y*log(sigmoid(x)) + (1-y)*log(1-sigmoid(x))]
    #      = sp_neg * (1 + (pw-1)*y) + x*(1-y)
    loss = sp_neg * (1.0 + w1 * y) + x * (1.0 - y)

    # Unclamped tile index: over-covered / duplicated (clamped index_map)
    # blocks land past `valid_rows` and are fully masked below.
    tile_idx = c * tiles_per_split + i
    rows_here = valid_rows - tile_idx * block_rows   # valid rows in this block

    # (8,128) accumulator: leading-axis sum of the (block_rows//8, 8, 128)
    # view is pure vreg adds (no XLU). Only boundary / over-covered blocks pay
    # for the row mask; interior blocks skip it entirely.
    @pl.when(rows_here >= block_rows)
    def _():
        acc_ref[...] += loss.reshape(-1, 8, LANES).sum(axis=0)

    @pl.when(rows_here < block_rows)
    def _():
        row_iota = jax.lax.broadcasted_iota(jnp.int32, (block_rows, LANES), 0)
        masked = jnp.where(row_iota < rows_here, loss, 0.0)
        acc_ref[...] += masked.reshape(-1, 8, LANES).sum(axis=0)

    @pl.when(i == pl.num_programs(1) - 1)
    def _():
        out_ref[...] = acc_ref[...]


def weighted_bce_with_logits_loss(outputs, targets, pos_weight=None):
    """Mean BCE-with-logits over all elements (matches torch semantics).

    `pos_weight` may be None, a Python float, or a (possibly traced) scalar.
    """
    assert outputs.shape == targets.shape
    # TODO(synk): per-class tensor pos_weight (torch allows a tensor) is not
    # supported; the reference module's signature declares a scalar float.
    if pos_weight is None:
        pw_arr = jnp.ones((1,), jnp.float32)
    else:
        pw_arr = jnp.asarray(pos_weight, dtype=jnp.float32).reshape((1,))
    pw = pw_arr[0]

    n = int(outputs.size)
    x_flat = jnp.ravel(outputs)   # native dtype streams through (bf16 OK)
    y_flat = jnp.ravel(targets)

    # Lane-aligned prefix goes through the kernel; the (<128-element) tail is
    # handled with a tiny jnp expression below.
    n_main = (n // LANES) * LANES
    rows = n_main // LANES

    total = jnp.float32(0.0)

    if rows > 0:
        x_main = x_flat if n_main == n else x_flat[:n_main]
        y_main = y_flat if n_main == n else y_flat[:n_main]

        num_splits, core_parallel = _tc_split_config()

        itembytes = (jnp.dtype(x_main.dtype).itemsize
                     + jnp.dtype(y_main.dtype).itemsize)
        max_block_rows = max(8, (_STEP_INPUT_BYTES // (LANES * itembytes)) // 8 * 8)

        if rows >= max_block_rows:
            block_rows = max_block_rows       # multiple of 8; ragged tail block OK
            lead_rows = rows
        else:
            # Small input: round rows up to a multiple of 8 with a tiny pad so
            # the in-kernel (rows//8, 8, 128) reduction view stays aligned.
            block_rows = _round_up(rows, 8)
            lead_rows = block_rows
            if lead_rows != rows:
                pad = (lead_rows - rows) * LANES
                x_main = jnp.pad(x_main, (0, pad))
                y_main = jnp.pad(y_main, (0, pad))

        x2 = x_main.reshape(lead_rows, LANES)
        y2 = y_main.reshape(lead_rows, LANES)

        num_tiles = pl.cdiv(lead_rows, block_rows)
        tiles_per_split = pl.cdiv(num_tiles, num_splits)

        def tile_map(c, i):
            # Clamp so block indices stay in bounds; duplicated reads are
            # zeroed by the in-kernel row mask (their rows_here <= 0).
            return (jnp.minimum(c * tiles_per_split + i, num_tiles - 1), 0)

        kernel = functools.partial(
            _bce_sum_kernel,
            block_rows=block_rows,
            tiles_per_split=tiles_per_split,
            valid_rows=rows,
        )

        if core_parallel:
            semantics = (pltpu.CORE_PARALLEL, pltpu.ARBITRARY)
        else:
            semantics = ("arbitrary", "arbitrary")

        partials = pl.pallas_call(
            kernel,
            out_shape=jax.ShapeDtypeStruct((num_splits * 8, LANES), jnp.float32),
            grid_spec=pltpu.PrefetchScalarGridSpec(
                num_scalar_prefetch=0,
                grid=(num_splits, tiles_per_split),
                in_specs=[
                    pl.BlockSpec(memory_space=pltpu.MemorySpace.SMEM),  # pos_weight
                    pl.BlockSpec((block_rows, LANES), tile_map),        # logits
                    pl.BlockSpec((block_rows, LANES), tile_map),        # targets
                ],
                out_specs=pl.BlockSpec((8, LANES), lambda c, i: (c, 0)),
                scratch_shapes=[pltpu.VMEM((8, LANES), jnp.float32)],
            ),
            compiler_params=pltpu.CompilerParams(
                dimension_semantics=semantics,
                vmem_limit_bytes=_VMEM_LIMIT_BYTES,
            ),
        )(pw_arr, x2, y2)

        total = total + jnp.sum(partials)

    # <128-element lane tail, finished in plain jnp (negligible work).
    if n_main != n:
        xt = x_flat[n_main:].astype(jnp.float32)
        yt = y_flat[n_main:].astype(jnp.float32)
        sp_neg = jnp.maximum(-xt, 0.0) + jnp.log1p(jnp.exp(-jnp.abs(xt)))
        total = total + jnp.sum(sp_neg * (1.0 + (pw - 1.0) * yt) + xt * (1.0 - yt))

    return total / jnp.float32(n)


def _reference_loss(outputs, targets, pos_weight=None):
    if pos_weight is None:
        pos_weight = 1.0
    x = outputs.astype(jnp.float32)
    y = targets.astype(jnp.float32)
    sp_neg = jnp.maximum(-x, 0.0) + jnp.log1p(jnp.exp(-jnp.abs(x)))
    loss = float(pos_weight) * y * sp_neg + (1.0 - y) * (x + sp_neg)
    return jnp.mean(loss)


if __name__ == "__main__":
    key = jax.random.PRNGKey(0)
    k1, k2, k3, k4 = jax.random.split(key, 4)

    # Small NCHW-style shape consistent with a segmentation model output.
    shape = (2, 4, 16, 16)
    logits = jax.random.normal(k1, shape, dtype=jnp.float32)
    targets = (jax.random.uniform(k2, shape) > 0.5).astype(jnp.float32)
    pos_weight = 2.0

    loss = weighted_bce_with_logits_loss(logits, targets, pos_weight=pos_weight)
    loss = jax.block_until_ready(loss)
    ref = _reference_loss(logits, targets, pos_weight=pos_weight)
    assert jnp.allclose(loss, ref, rtol=1e-5, atol=1e-5), (loss, ref)

    # Element count not a multiple of 128 exercises the row mask + lane tail.
    shape2 = (3, 5, 7, 11)
    logits2 = jax.random.normal(k3, shape2, dtype=jnp.float32)
    targets2 = jax.random.uniform(k4, shape2).astype(jnp.float32)  # soft targets
    loss2 = weighted_bce_with_logits_loss(logits2, targets2, pos_weight=None)
    loss2 = jax.block_until_ready(loss2)
    ref2 = _reference_loss(logits2, targets2, pos_weight=None)
    assert jnp.allclose(loss2, ref2, rtol=1e-5, atol=1e-5), (loss2, ref2)

    print("KERNEL_OK")
</pallas_src>

<mosaic_0001>
module attributes {stable_mosaic.version = 11 : i64} {
  func.func @_bce_sum_kernel(%arg0: i32, %arg1: i32, %arg2: memref<1xf32, #tpu.memory_space<smem>>, %arg3: memref<16x128xf32, #tpu.memory_space<vmem>>, %arg4: memref<16x128xf32, #tpu.memory_space<vmem>>, %arg5: memref<8x128xf32, #tpu.memory_space<vmem>>, %arg6: memref<8x128xf32, #tpu.memory_space<vmem>>) attributes {dimension_semantics = [#tpu.dimension_semantics<arbitrary>, #tpu.dimension_semantics<arbitrary>], iteration_bounds = array<i64: 1, 1>, scalar_prefetch = 0 : i64, scratch_operands = 1 : i64, tpu.core_type = #tpu.core_type<tc>, window_params = [{transform_indices = @transform_0, window_bounds = array<i64: 1>}, {transform_indices = @transform_1, window_bounds = array<i64: 16, 128>}, {transform_indices = @transform_2, window_bounds = array<i64: 16, 128>}, {transform_indices = @transform_3, window_bounds = array<i64: 8, 128>}]} {
    %c0_i32 = arith.constant 0 : i32
    %0 = arith.cmpi eq, %arg1, %c0_i32 : i32
    %1 = arith.extui %0 : i1 to i32
    %c0_i32_0 = arith.constant 0 : i32
    %2 = arith.cmpi ne, %1, %c0_i32_0 : i32
    scf.if %2 {
      %cst_17 = arith.constant 0.000000e+00 : f32
      %39 = vector.broadcast %cst_17 : f32 to vector<8x128xf32>
      %c0_18 = arith.constant 0 : index
      %c0_19 = arith.constant 0 : index
      %40 = vector.load %arg6[%c0_18, %c0_19] : memref<8x128xf32, #tpu.memory_space<vmem>>, vector<8x128xf32>
      tpu.vector_store %arg6[%c0_18, %c0_19], %39 {strides = array<i32>} : memref<8x128xf32, #tpu.memory_space<vmem>>, vector<8x128xf32>,
    } else {
    }
    %c0 = arith.constant 0 : index
    %c0_1 = arith.constant 0 : index
    %3 = vector.load %arg3[%c0, %c0_1] : memref<16x128xf32, #tpu.memory_space<vmem>>, vector<16x128xf32>
    %c0_2 = arith.constant 0 : index
    %c0_3 = arith.constant 0 : index
    %4 = vector.load %arg4[%c0_2, %c0_3] : memref<16x128xf32, #tpu.memory_space<vmem>>, vector<16x128xf32>
    %c0_4 = arith.constant 0 : index
    %5 = memref.load %arg2[%c0_4] : memref<1xf32, #tpu.memory_space<smem>>
    %cst = arith.constant 1.000000e+00 : f32
    %6 = arith.subf %5, %cst : f32
    %cst_5 = arith.constant 0.000000e+00 : f32
    %7 = vector.broadcast %cst_5 : f32 to vector<16x128xf32>
    %8 = arith.subf %7, %3 : vector<16x128xf32>
    %cst_6 = arith.constant 0.000000e+00 : f32
    %9 = vector.broadcast %cst_6 : f32 to vector<16x128xf32>
    %10 = arith.maximumf %8, %9 : vector<16x128xf32>
    %11 = math.absf %3 : vector<16x128xf32>
    %cst_7 = arith.constant 0.000000e+00 : f32
    %12 = vector.broadcast %cst_7 : f32 to vector<16x128xf32>
    %13 = arith.subf %12, %11 : vector<16x128xf32>
    %14 = math.exp %13 : vector<16x128xf32>
    %15 = math.log1p %14 : vector<16x128xf32>
    %16 = arith.addf %10, %15 : vector<16x128xf32>
    %17 = vector.broadcast %6 : f32 to vector<16x128xf32>
    %18 = arith.mulf %17, %4 : vector<16x128xf32>
    %cst_8 = arith.constant 1.000000e+00 : f32
    %19 = vector.broadcast %cst_8 : f32 to vector<16x128xf32>
    %20 = arith.addf %19, %18 : vector<16x128xf32>
    %21 = arith.mulf %16, %20 : vector<16x128xf32>
    %cst_9 = arith.constant 1.000000e+00 : f32
    %22 = vector.broadcast %cst_9 : f32 to vector<16x128xf32>
    %23 = arith.subf %22, %4 : vector<16x128xf32>
    %24 = arith.mulf %3, %23 : vector<16x128xf32>
    %25 = arith.addf %21, %24 : vector<16x128xf32>
    %c1_i32 = arith.constant 1 : i32
    %26 = arith.muli %arg0, %c1_i32 : i32
    %27 = arith.addi %26, %arg1 : i32
    %c16_i32 = arith.constant 16 : i32
    %28 = arith.muli %27, %c16_i32 : i32
    %c16_i32_10 = arith.constant 16 : i32
    %29 = arith.subi %c16_i32_10, %28 : i32
    %c16_i32_11 = arith.constant 16 : i32
    %30 = arith.cmpi sge, %29, %c16_i32_11 : i32
    %31 = arith.extui %30 : i1 to i32
    %c0_i32_12 = arith.constant 0 : i32
    %32 = arith.cmpi ne, %31, %c0_i32_12 : i32
    scf.if %32 {
      %c0_17 = arith.constant 0 : index
      %c0_18 = arith.constant 0 : index
      %39 = vector.load %arg6[%c0_17, %c0_18] : memref<8x128xf32, #tpu.memory_space<vmem>>, vector<8x128xf32>
      %40 = vector.shape_cast %25 : vector<16x128xf32> to vector<2x8x128xf32>
      %cst_19 = arith.constant dense<0.000000e+00> : vector<8x128xf32>
      %41 = vector.multi_reduction <add>, %40, %cst_19 [0] : vector<2x8x128xf32> to vector<8x128xf32>
      %42 = arith.addf %39, %41 : vector<8x128xf32>
      %c0_20 = arith.constant 0 : index
      %c0_21 = arith.constant 0 : index
      %43 = vector.load %arg6[%c0_20, %c0_21] : memref<8x128xf32, #tpu.memory_space<vmem>>, vector<8x128xf32>
      tpu.vector_store %arg6[%c0_20, %c0_21], %42 {strides = array<i32>} : memref<8x128xf32, #tpu.memory_space<vmem>>, vector<8x128xf32>,
    } else {
    }
    %c16_i32_13 = arith.constant 16 : i32
    %33 = arith.cmpi slt, %29, %c16_i32_13 : i32
    %34 = arith.extui %33 : i1 to i32
    %c0_i32_14 = arith.constant 0 : i32
    %35 = arith.cmpi ne, %34, %c0_i32_14 : i32
    scf.if %35 {
      %39 = tpu.iota {dimensions = array<i32: 0>} : vector<16x128xi32>
      %40 = vector.broadcast %29 : i32 to vector<16x128xi32>
      %41 = arith.cmpi slt, %39, %40 : vector<16x128xi32>
      %cst_17 = arith.constant 0.000000e+00 : f32
      %42 = vector.broadcast %cst_17 : f32 to vector<16x128xf32>
      %43 = arith.select %41, %25, %42 : vector<16x128xi1>, vector<16x128xf32>
      %c0_18 = arith.constant 0 : index
      %c0_19 = arith.constant 0 : index
      %44 = vector.load %arg6[%c0_18, %c0_19] : memref<8x128xf32, #tpu.memory_space<vmem>>, vector<8x128xf32>
      %45 = vector.shape_cast %43 : vector<16x128xf32> to vector<2x8x128xf32>
      %cst_20 = arith.constant dense<0.000000e+00> : vector<8x128xf32>
      %46 = vector.multi_reduction <add>, %45, %cst_20 [0] : vector<2x8x128xf32> to vector<8x128xf32>
      %47 = arith.addf %44, %46 : vector<8x128xf32>
      %c0_21 = arith.constant 0 : index
      %c0_22 = arith.constant 0 : index
      %48 = vector.load %arg6[%c0_21, %c0_22] : memref<8x128xf32, #tpu.memory_space<vmem>>, vector<8x128xf32>
      tpu.vector_store %arg6[%c0_21, %c0_22], %47 {strides = array<i32>} : memref<8x128xf32, #tpu.memory_space<vmem>>, vector<8x128xf32>,
    } else {
    }
    %c0_i32_15 = arith.constant 0 : i32
    %36 = arith.cmpi eq, %arg1, %c0_i32_15 : i32
    %37 = arith.extui %36 : i1 to i32
    %c0_i32_16 = arith.constant 0 : i32
    %38 = arith.cmpi ne, %37, %c0_i32_16 : i32
    scf.if %38 {
      %c0_17 = arith.constant 0 : index
      %c0_18 = arith.constant 0 : index
      %39 = vector.load %arg6[%c0_17, %c0_18] : memref<8x128xf32, #tpu.memory_space<vmem>>, vector<8x128xf32>
      %c0_19 = arith.constant 0 : index
      %c0_20 = arith.constant 0 : index
      %40 = vector.load %arg5[%c0_19, %c0_20] : memref<8x128xf32, #tpu.memory_space<vmem>>, vector<8x128xf32>
      tpu.vector_store %arg5[%c0_19, %c0_20], %39 {strides = array<i32>} : memref<8x128xf32, #tpu.memory_space<vmem>>, vector<8x128xf32>,
    } else {
    }
    return
  }
  func.func @transform_0(%arg0: i32, %arg1: i32) -> i32 {
    %c0_i32 = arith.constant 0 : i32
    %c0_i32_0 = arith.constant 0 : i32
    return %c0_i32 : i32
  }
  func.func @transform_1(%arg0: i32, %arg1: i32) -> (i32, i32) {
    %c1_i32 = arith.constant 1 : i32
    %0 = arith.muli %arg0, %c1_i32 : i32
    %1 = arith.addi %0, %arg1 : i32
    %c0_i32 = arith.constant 0 : i32
    %2 = arith.minsi %1, %c0_i32 : i32
    %c0_i32_0 = arith.constant 0 : i32
    %c0_i32_1 = arith.constant 0 : i32
    return %2, %c0_i32_0 : i32, i32
  }
  func.func @transform_2(%arg0: i32, %arg1: i32) -> (i32, i32) {
    %c1_i32 = arith.constant 1 : i32
    %0 = arith.muli %arg0, %c1_i32 : i32
    %1 = arith.addi %0, %arg1 : i32
    %c0_i32 = arith.constant 0 : i32
    %2 = arith.minsi %1, %c0_i32 : i32
    %c0_i32_0 = arith.constant 0 : i32
    %c0_i32_1 = arith.constant 0 : i32
    return %2, %c0_i32_0 : i32, i32
  }
  func.func @transform_3(%arg0: i32, %arg1: i32) -> (i32, i32) {
    %c0_i32 = arith.constant 0 : i32
    %c0_i32_0 = arith.constant 0 : i32
    return %arg0, %c0_i32 : i32, i32
  }
}

</mosaic_0001>

<bundles_post_ra>
// kernel: tpu_custom_call.1
= control target key start
LH: loop header
LB: loop body
LE: loop exit
PB: predicated region body
PF: predicated region fallthrough
CT: control target
= control target key end

     0   :  { %9 = vsyncpa [#allocation5], 0  ;;  %s322_s0 = inlined_call_operand.<no memory space> [shape: f32[1], index: 0, kind: input, shape index: {}]   ;;  %s323_s1 = inlined_call_operand.hbm [shape: f32[16,128], index: 1, kind: input, shape index: {}]   ;;  %s324_s2 = inlined_call_operand.hbm [shape: f32[16,128], index: 2, kind: input, shape index: {}]   ;;  %s325_s3 = inlined_call_operand.hbm [shape: f32[8,128], index: 3, kind: output, shape index: {}]  }
   0x1   :  { %10 = vsyncpa [#allocation8], 0 }
   0x2   :  { %11 = vsyncpa [#allocation6], 0  ;;  %s258_s12 = smov [#allocation4]   ;;  %s186_s16 = scalar_lea.hbm %s323_s1, 256 }
   0x3   :  { %s25_s13 = sshll.u32 %s258_s12, 4  ;;  %p187_p0 = scmp.ne.s32.totalorder %s323_s1, %s186_s16  ;;  %s26_s13 = int_to_ptr.vmem [resolvable:$true] %s25_s13 }
   0x4   :  { %p190_p1 = scmp.lt.u32.totalorder %s186_s16, %s323_s1 }
   0x6   :  { %p192_p2 = pnand %p190_p1, %p187_p0 }
   0x8   :  { %195 = shalt.err (!%p192_p2)
}
   0x9   :  { %s196_s21 = scalar_lea.vmem %s26_s13, 256  ;;  %p201_p4 = scmp.lt.s32.totalorder %s26_s13, %s26_s13 }
   0xa   :  { %p197_p3 = scmp.ne.s32.totalorder %s26_s13, %s196_s21  ;;  %p202_p5 = scmp.lt.s32.totalorder %s196_s21, %s196_s21 }
   0xc   :  { %p203_p6 = por %p202_p5, %p201_p4 }
   0xe   :  { %p204_p7 = pnand %p203_p6, %p197_p3 }
  0x10   :  { %207 = shalt.err (!%p204_p7)
}
  0x11   :  { %s259_s22 = smov 128   ;;  %s260_s23 = smov 8  }
  0x12   :  { %31 = dma.hbm_to_vmem [thread:$0]  %s323_s1, 256, %s26_s13, [#allocation5], %s259_s22, %s259_s22, %s260_s23  }
  0x13   :  { %s261_s26 = smov [#allocation7]   ;;  %s208_s30 = scalar_lea.hbm %s324_s2, 256 }
  0x14   :  { %s43_s27 = sshll.u32 %s261_s26, 4  ;;  %p209_p8 = scmp.ne.s32.totalorder %s324_s2, %s208_s30  ;;  %s44_s27 = int_to_ptr.vmem [resolvable:$true] %s43_s27 }
  0x15   :  { %p212_p9 = scmp.lt.u32.totalorder %s208_s30, %s324_s2 }
  0x17   :  { %p214_p10 = pnand %p212_p9, %p209_p8 }
  0x19   :  { %217 = shalt.err (!%p214_p10)
}
  0x1a   :  { %s218_s8 = scalar_lea.vmem %s44_s27, 256  ;;  %p223_p12 = scmp.lt.s32.totalorder %s44_s27, %s44_s27 }
  0x1b   :  { %p219_p11 = scmp.ne.s32.totalorder %s44_s27, %s218_s8  ;;  %p224_p13 = scmp.lt.s32.totalorder %s218_s8, %s218_s8 }
  0x1d   :  { %p225_p0 = por %p224_p13, %p223_p12 }
  0x1f   :  { %p226_p1 = pnand %p225_p0, %p219_p11 }
  0x21   :  { %229 = shalt.err (!%p226_p1)
}
  0x22   :  { %49 = dma.hbm_to_vmem [thread:$0]  %s324_s2, 256, %s44_s27, [#allocation8], %s259_s22, %s259_s22, %s260_s23  }
  0x23   :  { %252 = dma.done.wait [#allocation5], 256  }
  0x24   :  { %253 = vsyncadd [#allocation5], 4294967040 }
  0x25   :  { %254 = dma.done.wait [#allocation8], 256  }
  0x26   :  { %255 = vsyncadd [#allocation8], 4294967040  ;;  %v69_v0 = vld [vmem:[#allocation4] sm:$0xff]  ;;  %v70_v1 = vld [vmem:[#allocation4 + $0x8] sm:$0xff]  ;;  %s172_s11 = sadd.f32 -1.0, %s322_s0  ;;  %s262_s0 = smov [#allocation9]  }
  0x27   :  { %v79_v2 = vand.u32 2147483647, %v69_v0  ;;  %v80_v3 = vand.u32 2147483647, %v70_v1  ;;  %v71_v14 = vld [vmem:[#allocation7] sm:$0xff]  ;;  %v72_v17 = vld [vmem:[#allocation7 + $0x8] sm:$0xff] }
  0x28   :  { %v107_v16 = vstv %s172_s11  ;;  %v75_v18 = vsub.f32 0.0, %v69_v0  ;;  %v76_v21 = vsub.f32 0.0, %v70_v1  ;;  %v114_v29 = vsub.f32 1.0, %v71_v14  ;;  %s158_s12 = sshll.u32 %s262_s0, 4  ;;  %s159_s12 = int_to_ptr.vmem [resolvable:$true] %s158_s12 }
  0x29   :  { %v81_v4 = vsub.f32 0.0, %v79_v2  ;;  %v82_v5 = vsub.f32 0.0, %v80_v3  ;;  %v108_v23 = vmul.f32 %v107_v16, %v71_v14  ;;  %v109_v25 = vmul.f32 %v107_v16, %v72_v17  ;;  %s230_s13 = scalar_lea.vmem %s159_s12, 128  ;;  %p235_p3 = scmp.lt.s32.totalorder %s159_s12, %s159_s12 }
  0x2a   :  { %v77_v27 = vmax.f32 %v75_v18, 0.0  ;;  %v78_v31 = vmax.f32 %v76_v21, 0.0  ;;  %v115_v33 = vsub.f32 1.0, %v72_v17  ;;  %v116_v40 = vmul.f32 %v114_v29, %v69_v0  ;;  %p231_p2 = scmp.ne.s32.totalorder %s159_s12, %s230_s13  ;;  %p236_p4 = scmp.lt.s32.totalorder %s230_s13, %s230_s13 }
  0x2b   :  { %v83_v6 = vmul.f32 1.442695, %v81_v4  ;;  %v85_v7 = vmul.f32 1.442695, %v82_v5  ;;  %v110_v35 = vadd.f32 1.0, %v108_v23  ;;  %v111_v37 = vadd.f32 1.0, %v109_v25 }
  0x2c   :  { %v117_v42 = vmul.f32 %v115_v33, %v70_v1  ;;  %p237_p5 = por %p236_p4, %p235_p3 }
  0x2d   :  { %178 = vpow2.f32 %v83_v6 }
  0x2e   :  { %180 = vpow2.f32 %v85_v7  ;;  %p238_p6 = pnand %p237_p5, %p231_p2 }
  0x37   :  { %v179_v8 = vpop.eup %178 }
  0x38   :  { %v181_v9 = vpop.eup %180  ;;  %v87_v10 = vadd.f32 1.0, %v179_v8  ;;  %v90_v12 = vmul.f32 -0.5, %v179_v8  ;;  %v93_v19 = vand.u32 2147483647, %v179_v8 }
  0x39   :  { %v96_v11 = vadd.f32 1.0, %v181_v9  ;;  %v99_v13 = vmul.f32 -0.5, %v181_v9  ;;  %v102_v22 = vand.u32 2147483647, %v181_v9 }
  0x3a   :  { %182 = vlog2.f32 %v87_v10  ;;  %v91_v15 = vadd.f32 1.0, %v90_v12  ;;  %vm94_vm0 = vcmp.lt.f32.partialorder %v93_v19, 0.0004427343 }
  0x3b   :  { %184 = vlog2.f32 %v96_v11  ;;  %v100_v20 = vadd.f32 1.0, %v99_v13  ;;  %vm103_vm1 = vcmp.lt.f32.partialorder %v102_v22, 0.0004427343 }
  0x3c   :  { %v92_v24 = vmul.f32 %v179_v8, %v91_v15 }
  0x3d   :  { %v101_v28 = vmul.f32 %v181_v9, %v100_v20 }
  0x44   :  { %v183_v26 = vpop.eup %182 }
  0x45   :  { %v185_v30 = vpop.eup %184  ;;  %v89_v32 = vmul.f32 0.6931472, %v183_v26 }
  0x46   :  { %v98_v34 = vmul.f32 0.6931472, %v185_v30 }
  0x47   :  { %v95_v36 = vsel %vm94_vm0, %v92_v24, %v89_v32 }
  0x48   :  { %v104_v38 = vsel %vm103_vm1, %v101_v28, %v98_v34  ;;  %v105_v39 = vadd.f32 %v95_v36, %v77_v27 }
  0x49   :  { %v106_v41 = vadd.f32 %v104_v38, %v78_v31 }
  0x4a   :  { %v112_v43 = vmul.f32 %v110_v35, %v105_v39 }
  0x4b   :  { %v113_v44 = vmul.f32 %v111_v37, %v106_v41 }
  0x4c   :  { %v118_v45 = vadd.f32 %v116_v40, %v112_v43 }
  0x4d   :  { %v119_v46 = vadd.f32 %v117_v42, %v113_v44 }
  0x4f   :  { %v128_v47 = vadd.f32 %v119_v46, %v118_v45 }
  0x51   :  { %151 = vst [vmem:[#allocation9] sm:$0xff] %v128_v47 }
  0x52   :  { %241 = shalt.err (!%p238_p6)
}
  0x53   :  { %s242_s16 = scalar_lea.hbm %s325_s3, 128 }
  0x54   :  { %p243_p7 = scmp.ne.s32.totalorder %s325_s3, %s242_s16  ;;  %p246_p8 = scmp.lt.u32.totalorder %s242_s16, %s325_s3 }
  0x56   :  { %p248_p9 = pnand %p246_p8, %p243_p7 }
  0x58   :  { %251 = shalt.err (!%p248_p9)
}
  0x59   :  { %161 = dma.vmem_to_hbm [thread:$0]  %s159_s12, 128, %s325_s3, [#allocation6]  }
  0x5a   :  { %256 = dma.done.wait [#allocation6], 128  }
  0x5b   :  { %257 = vsyncadd [#allocation6], 4294967168 }
  0x5c   :  { %165 = vsyncpa [#allocation5], 1 }
  0x5d   :  { %166 = vsyncpa [#allocation8], 1 }
  0x5e   :  { %167 = vsyncpa [#allocation6], 1 }

</bundles_post_ra>
